<compile_context>
chip_gen: v6e
topology: v6e:2x2x1
jax: 0.10.0
libtpu: 0.0.40
codegen_flags: <defaults>
</compile_context>

<pallas_src>
import functools

import jax
import jax.numpy as jnp
from jax.experimental import pallas as pl
from jax.experimental.pallas import tpu as pltpu


def _bce_ls(x, t, smoothing):
    """Elementwise label-smoothed BCE-with-logits (numerically stable form)."""
    t_smooth = t * (1.0 - smoothing) + 0.5 * smoothing
    return jnp.maximum(x, 0.0) - x * t_smooth + jnp.log1p(jnp.exp(-jnp.abs(x)))


def _bce_ls_sum_small_kernel(x_ref, t_ref, o_ref, *, smoothing):
    """Single-shot path: whole problem in one block, one reduce, one store."""
    x = x_ref[...].astype(jnp.float32)
    t = t_ref[...].astype(jnp.float32)
    loss = _bce_ls(x, t, smoothing)
    o_ref[...] = jnp.sum(loss, keepdims=True)                  # (1, 1)


def _bce_ls_sum_grid_kernel(x_ref, t_ref, o_ref, acc_ref, *,
                            smoothing, n_valid, width, tile_rows, steps):
    """Grid path: (shards, steps) grid over lane-dense row tiles.

    acc_ref is a tile-shaped f32 accumulator; per-step accumulation is pure
    VPU (elementwise add) on interior tiles.  The single XLU reduce happens
    only on the last step of each shard, and the tail mask is only paid by
    blocks that actually touch invalid elements.
    """
    p = pl.program_id(0)            # parallel shard (per-TensorCore on v7x)
    s = pl.program_id(1)            # arbitrary reduction over row tiles

    @pl.when(s == 0)
    def _():
        acc_ref[...] = jnp.zeros_like(acc_ref)

    x = x_ref[...].astype(jnp.float32)
    t = t_ref[...].astype(jnp.float32)
    loss = _bce_ls(x, t, smoothing)

    block_id = p * steps + s
    row0 = block_id * tile_rows
    # Does this tile touch any element past the valid range?  (tail of the
    # last real block, or an over-provisioned clamped block.)
    needs_mask = (row0 + tile_rows) * width > n_valid

    @pl.when(needs_mask)
    def _():
        r = jax.lax.broadcasted_iota(jnp.int32, loss.shape, 0)
        c = jax.lax.broadcasted_iota(jnp.int32, loss.shape, 1)
        idx = (row0 + r) * width + c
        # Select (not multiply-by-mask): padded/garbage rows may hold Inf/NaN.
        acc_ref[...] += jnp.where(idx < n_valid, loss, 0.0)

    @pl.when(jnp.logical_not(needs_mask))
    def _():
        acc_ref[...] += loss        # fast interior path: pure VPU add

    @pl.when(s == steps - 1)
    def _():
        o_ref[0] = jnp.sum(acc_ref[...], keepdims=True)        # (1, 1) per shard


def _padded_vmem_bytes(shape, dtype):
    r, c = shape
    return (pl.cdiv(r, 8) * 8) * (pl.cdiv(c, 128) * 128) * jnp.dtype(dtype).itemsize


def _default_num_shards():
    # v7x has 2 TensorCores per chip; v5e/v6e have 1 — on single-TC parts the
    # shard axis is just a serial loop, so don't pay for it.
    try:
        kind = jax.devices()[0].device_kind.lower()
    except Exception:
        return 1
    return 2 if ("v7" in kind or "7x" in kind) else 1


def label_smoothing_bce_loss(inputs, targets, smoothing=0.1, *,
                             num_shards=None,
                             target_block_bytes=4 * 1024 * 1024,
                             small_path_bytes=2 * 1024 * 1024,
                             cast_inputs_to_bf16=False):
    """inputs: (B, C) logits; targets: (B, C) labels in any float/int dtype
    (e.g. bf16 to cut HBM bytes -- upcast in-kernel).  Returns scalar f32 mean."""
    B, C = inputs.shape
    assert targets.shape == (B, C)
    n_valid = B * C
    smoothing = float(smoothing)

    if cast_inputs_to_bf16 and inputs.dtype == jnp.float32:
        # Optional HBM-traffic saver (~33% fewer bytes on the HBM-bound path);
        # changes numerics slightly and only pays off if the cast fuses into
        # the producer, hence off by default.
        inputs = inputs.astype(jnp.bfloat16)

    # ---------------- small path: one block, no grid ----------------
    if (_padded_vmem_bytes((B, C), inputs.dtype)
            + _padded_vmem_bytes((B, C), targets.dtype)) <= small_path_bytes:
        kernel = functools.partial(_bce_ls_sum_small_kernel, smoothing=smoothing)
        total = pl.pallas_call(
            kernel,
            out_shape=jax.ShapeDtypeStruct((1, 1), jnp.float32),
            compiler_params=pltpu.CompilerParams(
                vmem_limit_bytes=32 * 1024 * 1024),
        )(inputs, targets)
        return total[0, 0] / n_valid

    # ------ grid path: lane-dense view + big row tiles + per-core partials ------
    if C % 128 == 0:
        x_view, t_view = inputs, targets
        width, rows = C, B
    else:
        # Lane-dense flatten: avoid wasting VMEM lanes / masked vector loads
        # on a sub-128 (or non-multiple-of-128) class count.
        width = 512
        padded_n = pl.cdiv(n_valid, width) * width
        pad = padded_n - n_valid
        x_flat = inputs.reshape(-1)
        t_flat = targets.reshape(-1)
        if pad:
            x_flat = jnp.pad(x_flat, (0, pad))
            t_flat = jnp.pad(t_flat, (0, pad))
        x_view = x_flat.reshape(-1, width)
        t_view = t_flat.reshape(-1, width)
        rows = padded_n // width

    # Size tiles by their f32 footprint so the accumulator budget stays stable
    # regardless of the input dtype.
    tile_rows = (target_block_bytes // (width * 4)) // 8 * 8
    tile_rows = int(max(8, min(tile_rows, pl.cdiv(rows, 8) * 8)))
    n_blocks = pl.cdiv(rows, tile_rows)

    if num_shards is None:
        num_shards = _default_num_shards()
    shards = int(max(1, min(num_shards, n_blocks)))
    steps = pl.cdiv(n_blocks, shards)

    def in_map(p, s):
        # Clamp over-provisioned block ids (when n_blocks % shards != 0);
        # their contribution is fully masked to zero inside the kernel.
        return (jnp.minimum(p * steps + s, n_blocks - 1), 0)

    kernel = functools.partial(
        _bce_ls_sum_grid_kernel,
        smoothing=smoothing, n_valid=n_valid, width=width,
        tile_rows=tile_rows, steps=steps)

    # VMEM budget: 2x x-tile + 2x t-tile + acc  (~16-24 MiB at 4 MiB f32 tiles)
    # -- safely under the 32 MiB scoped limit on every generation.
    # TODO(synk): on v7x, profile that the leading "parallel" axis really lands
    # one shard per TensorCore; switch to pltpu.CORE_PARALLEL if it serializes.
    partials = pl.pallas_call(
        kernel,
        out_shape=jax.ShapeDtypeStruct((shards, 1, 1), jnp.float32),
        grid_spec=pltpu.PrefetchScalarGridSpec(
            num_scalar_prefetch=0,
            grid=(shards, steps),
            in_specs=[
                pl.BlockSpec((tile_rows, width), in_map),
                pl.BlockSpec((tile_rows, width), in_map),
            ],
            out_specs=pl.BlockSpec((1, 1, 1), lambda p, s: (p, 0, 0)),
            scratch_shapes=[pltpu.VMEM((tile_rows, width), jnp.float32)],
        ),
        compiler_params=pltpu.CompilerParams(
            dimension_semantics=("parallel", "arbitrary"),
            vmem_limit_bytes=32 * 1024 * 1024,
        ),
    )(x_view, t_view)
    return jnp.sum(partials) / n_valid


def _reference(inputs, targets, smoothing=0.1):
    x = inputs.astype(jnp.float32)
    t = targets.astype(jnp.float32) * (1.0 - smoothing) + 0.5 * smoothing
    loss = jnp.maximum(x, 0.0) - x * t + jnp.log1p(jnp.exp(-jnp.abs(x)))
    return jnp.mean(loss)


if __name__ == "__main__":
    key = jax.random.PRNGKey(0)
    k1, k2, k3, k4, k5, k6 = jax.random.split(key, 6)

    # ---- main check: (batch, num_classes) as in the PyTorch module ----
    B, C = 16, 128
    logits = jax.random.normal(k1, (B, C), dtype=jnp.float32)
    targets = (jax.random.uniform(k2, (B, C)) > 0.5).astype(jnp.float32)
    # Pass targets as bf16 ({0,1} exact) to cut HBM bytes; kernel upcasts.
    loss = label_smoothing_bce_loss(
        logits, targets.astype(jnp.bfloat16), smoothing=0.1)
    loss = jax.block_until_ready(loss)
    ref = _reference(logits, targets, smoothing=0.1)
    assert jnp.allclose(loss, ref, rtol=1e-4, atol=1e-5), (loss, ref)

    # ---- grid path: non-lane-friendly C exercises the lane-dense flatten ----
    B2, C2 = 50, 96
    logits2 = jax.random.normal(k3, (B2, C2), dtype=jnp.float32)
    targets2 = (jax.random.uniform(k4, (B2, C2)) > 0.5).astype(jnp.float32)
    loss2 = label_smoothing_bce_loss(
        logits2, targets2.astype(jnp.bfloat16), smoothing=0.1,
        num_shards=2, target_block_bytes=4096, small_path_bytes=0)
    loss2 = jax.block_until_ready(loss2)
    ref2 = _reference(logits2, targets2, smoothing=0.1)
    assert jnp.allclose(loss2, ref2, rtol=1e-4, atol=1e-5), (loss2, ref2)

    # ---- grid path: odd block count + 2 shards (clamped block fully masked) ----
    B3, C3 = 100, 96
    logits3 = jax.random.normal(k5, (B3, C3), dtype=jnp.float32)
    targets3 = (jax.random.uniform(k6, (B3, C3)) > 0.5).astype(jnp.float32)
    loss3 = label_smoothing_bce_loss(
        logits3, targets3, smoothing=0.1,
        num_shards=2, target_block_bytes=4096, small_path_bytes=0)
    loss3 = jax.block_until_ready(loss3)
    ref3 = _reference(logits3, targets3, smoothing=0.1)
    assert jnp.allclose(loss3, ref3, rtol=1e-4, atol=1e-5), (loss3, ref3)

    print("KERNEL_OK")
</pallas_src>

<mosaic_0001>
module attributes {stable_mosaic.version = 11 : i64} {
  func.func @_bce_ls_sum_small_kernel(%arg0: memref<16x128xf32, #tpu.memory_space<vmem>>, %arg1: memref<16x128xbf16, #tpu.memory_space<vmem>>, %arg2: memref<1x1xf32, #tpu.memory_space<vmem>>) attributes {dimension_semantics = [], scalar_prefetch = 0 : i64, scratch_operands = 0 : i64, tpu.core_type = #tpu.core_type<tc>} {
    %c0 = arith.constant 0 : index
    %c0_0 = arith.constant 0 : index
    %0 = vector.load %arg0[%c0, %c0_0] : memref<16x128xf32, #tpu.memory_space<vmem>>, vector<16x128xf32>
    %c0_1 = arith.constant 0 : index
    %c0_2 = arith.constant 0 : index
    %1 = vector.load %arg1[%c0_1, %c0_2] : memref<16x128xbf16, #tpu.memory_space<vmem>>, vector<16x128xbf16>
    %2 = arith.extf %1 : vector<16x128xbf16> to vector<16x128xf32>
    %cst = arith.constant 0.899999976 : f32
    %3 = vector.broadcast %cst : f32 to vector<16x128xf32>
    %4 = arith.mulf %2, %3 : vector<16x128xf32>
    %cst_3 = arith.constant 5.000000e-02 : f32
    %5 = vector.broadcast %cst_3 : f32 to vector<16x128xf32>
    %6 = arith.addf %4, %5 : vector<16x128xf32>
    %cst_4 = arith.constant 0.000000e+00 : f32
    %7 = vector.broadcast %cst_4 : f32 to vector<16x128xf32>
    %8 = arith.maximumf %0, %7 : vector<16x128xf32>
    %9 = arith.mulf %0, %6 : vector<16x128xf32>
    %10 = arith.subf %8, %9 : vector<16x128xf32>
    %11 = math.absf %0 : vector<16x128xf32>
    %cst_5 = arith.constant 0.000000e+00 : f32
    %12 = vector.broadcast %cst_5 : f32 to vector<16x128xf32>
    %13 = arith.subf %12, %11 : vector<16x128xf32>
    %14 = math.exp %13 : vector<16x128xf32>
    %15 = math.log1p %14 : vector<16x128xf32>
    %16 = arith.addf %10, %15 : vector<16x128xf32>
    %17 = vector.shape_cast %16 : vector<16x128xf32> to vector<1x16x128xf32>
    %cst_6 = arith.constant dense<0.000000e+00> : vector<1xf32>
    %18 = vector.multi_reduction <add>, %17, %cst_6 [1, 2] : vector<1x16x128xf32> to vector<1xf32>
    %19 = vector.shape_cast %18 : vector<1xf32> to vector<1x1x1xf32>
    %20 = vector.extract %19[0, 0, 0] : f32 from vector<1x1x1xf32>
    %21 = vector.broadcast %20 : f32 to vector<1x1xf32>
    %c0_7 = arith.constant 0 : index
    %c0_8 = arith.constant 0 : index
    %22 = vector.load %arg2[%c0_7, %c0_8] : memref<1x1xf32, #tpu.memory_space<vmem>>, vector<1x1xf32>
    tpu.vector_store %arg2[%c0_7, %c0_8], %21 {strides = array<i32>} : memref<1x1xf32, #tpu.memory_space<vmem>>, vector<1x1xf32>,
    return
  }
}

</mosaic_0001>

<bundles_post_ra>
// kernel: tpu_custom_call.1
= control target key start
LH: loop header
LB: loop body
LE: loop exit
PB: predicated region body
PF: predicated region fallthrough
CT: control target
= control target key end

     0   :  { %7 = vsyncpa [#allocation3], 0  ;;  %s231_s0 = inlined_call_operand.hbm [shape: f32[16,128], index: 0, kind: input, shape index: {}]   ;;  %s232_s1 = inlined_call_operand.hbm [shape: bf16[16,128], index: 1, kind: input, shape index: {}]   ;;  %s233_s2 = inlined_call_operand.hbm [shape: f32[1,1], index: 2, kind: output, shape index: {}]  }
   0x1   :  { %8 = vsyncpa [#allocation6], 0 }
   0x2   :  { %9 = vsyncpa [#allocation4], 0  ;;  %s200_s9 = smov [#allocation2]  }
   0x3   :  { %s15_s10 = sshll.u32 %s200_s9, 4  ;;  %s16_s10 = int_to_ptr.vmem [resolvable:$true] %s15_s10 }
   0x4   :  { %s142_s11 = scalar_lea.vmem %s16_s10, 256  ;;  %p147_p1 = scmp.lt.s32.totalorder %s16_s10, %s16_s10 }
   0x5   :  { %p143_p0 = scmp.ne.s32.totalorder %s16_s10, %s142_s11  ;;  %p148_p2 = scmp.lt.s32.totalorder %s142_s11, %s142_s11 }
   0x7   :  { %p149_p3 = por %p148_p2, %p147_p1 }
   0x9   :  { %p150_p4 = pnand %p149_p3, %p143_p0 }
   0xb   :  { %153 = shalt.err (!%p150_p4)
}
   0xc   :  { %s201_s12 = smov 128   ;;  %s202_s13 = smov 8  }
   0xd   :  { %21 = dma.hbm_to_vmem [thread:$0]  %s231_s0, 256, %s16_s10, [#allocation3], %s201_s12, %s201_s12, %s202_s13  }
   0xe   :  { %s203_s16 = smov [#allocation5]  }
   0xf   :  { %s27_s17 = sshll.u32 %s203_s16, 4  ;;  %s28_s17 = int_to_ptr.vmem [resolvable:$true] %s27_s17 }
  0x10   :  { %s162_s18 = scalar_lea.vmem %s28_s17, 128  ;;  %p167_p6 = scmp.lt.s32.totalorder %s28_s17, %s28_s17 }
  0x11   :  { %p163_p5 = scmp.ne.s32.totalorder %s28_s17, %s162_s18  ;;  %p168_p7 = scmp.lt.s32.totalorder %s162_s18, %s162_s18 }
  0x13   :  { %p169_p8 = por %p168_p7, %p167_p6 }
  0x15   :  { %p170_p9 = pnand %p169_p8, %p163_p5 }
  0x17   :  { %173 = shalt.err (!%p170_p9)
}
  0x18   :  { %s204_s19 = smov 64   ;;  %s205_s20 = smov 4  }
  0x19   :  { %33 = dma.hbm_to_vmem [thread:$0]  %s232_s1, 128, %s28_s17, [#allocation6], %s204_s19, %s204_s19, %s205_s20  }
  0x1a   :  { %194 = dma.done.wait [#allocation3], 256  }
  0x1b   :  { %195 = vsyncadd [#allocation3], 4294967040 }
  0x1c   :  { %196 = dma.done.wait [#allocation6], 128  }
  0x1d   :  { %197 = vsyncadd [#allocation6], 4294967168  ;;  %v40_v0 = vld [vmem:[#allocation2] sm:$0xff]  ;;  %v41_v1 = vld [vmem:[#allocation2 + $0x8] sm:$0xff]  ;;  %s206_s0 = smov [#allocation7]   ;;  %vm95_vm2 = vcmask 0  }
  0x1e   :  { %v56_v2 = vand.u32 2147483647, %v40_v0  ;;  %v57_v3 = vand.u32 2147483647, %v41_v1  ;;  %v114_v8 = vld [vmem:[#allocation5] sm:$0xff]   ;;  %v50_v22 = vmax.f32 %v40_v0, 0.0 }
  0x1f   :  { %v115_v10 = vunpack.c.l.bf16 %v114_v8  ;;  %v116_v12 = vunpack.c.h.bf16 %v114_v8  ;;  %v51_v26 = vmax.f32 %v41_v1, 0.0  ;;  %s103_s1 = sshll.u32 %s206_s0, 4  ;;  %s104_s1 = int_to_ptr.vmem [resolvable:$true] %s103_s1 }
  0x20   :  { %v58_v4 = vsub.f32 0.0, %v56_v2  ;;  %v59_v5 = vsub.f32 0.0, %v57_v3  ;;  %s174_s24 = scalar_lea.vmem %s104_s1, 16  ;;  %s178_s25 = scalar_lea.vmem %s104_s1, 32 }
  0x21   :  { %v46_v15 = vmul.f32 0.9, %v115_v10  ;;  %v47_v16 = vmul.f32 0.9, %v116_v12  ;;  %p175_p10 = scmp.ne.s32.totalorder %s104_s1, %s174_s24  ;;  %p179_p11 = scmp.lt.s32.totalorder %s104_s1, %s104_s1 }
  0x22   :  { %v60_v6 = vmul.f32 1.442695, %v58_v4  ;;  %v62_v7 = vmul.f32 1.442695, %v59_v5  ;;  %p180_p12 = scmp.lt.s32.totalorder %s178_s25, %s174_s24 }
  0x23   :  { %v48_v18 = vadd.f32 0.05, %v46_v15  ;;  %v49_v20 = vadd.f32 0.05, %v47_v16 }
  0x24   :  { %126 = vpow2.f32 %v60_v6  ;;  %p181_p13 = por %p180_p12, %p179_p11 }
  0x25   :  { %128 = vpow2.f32 %v62_v7  ;;  %v52_v23 = vmul.f32 %v48_v18, %v40_v0  ;;  %v53_v27 = vmul.f32 %v49_v20, %v41_v1 }
  0x26   :  { %p182_p0 = pnand %p181_p13, %p175_p10 }
  0x27   :  { %v54_v31 = vsub.f32 %v50_v22, %v52_v23  ;;  %v55_v34 = vsub.f32 %v51_v26, %v53_v27 }
  0x31   :  { %v127_v9 = vpop.eup %126 }
  0x32   :  { %v129_v11 = vpop.eup %128  ;;  %v64_v13 = vadd.f32 1.0, %v127_v9  ;;  %v67_v17 = vmul.f32 -0.5, %v127_v9  ;;  %v70_v24 = vand.u32 2147483647, %v127_v9 }
  0x33   :  { %v73_v14 = vadd.f32 1.0, %v129_v11  ;;  %v76_v19 = vmul.f32 -0.5, %v129_v11  ;;  %v79_v28 = vand.u32 2147483647, %v129_v11 }
  0x34   :  { %130 = vlog2.f32 %v64_v13  ;;  %v68_v21 = vadd.f32 1.0, %v67_v17  ;;  %vm71_vm0 = vcmp.lt.f32.partialorder %v70_v24, 0.0004427343 }
  0x35   :  { %132 = vlog2.f32 %v73_v14  ;;  %v77_v25 = vadd.f32 1.0, %v76_v19  ;;  %vm80_vm1 = vcmp.lt.f32.partialorder %v79_v28, 0.0004427343 }
  0x36   :  { %v69_v29 = vmul.f32 %v127_v9, %v68_v21 }
  0x37   :  { %v78_v32 = vmul.f32 %v129_v11, %v77_v25 }
  0x41   :  { %v131_v30 = vpop.eup %130 }
  0x42   :  { %v133_v33 = vpop.eup %132  ;;  %v66_v35 = vmul.f32 0.6931472, %v131_v30 }
  0x43   :  { %v75_v36 = vmul.f32 0.6931472, %v133_v33 }
  0x44   :  { %v72_v37 = vsel %vm71_vm0, %v69_v29, %v66_v35 }
  0x45   :  { %v81_v38 = vsel %vm80_vm1, %v78_v32, %v75_v36  ;;  %v82_v39 = vadd.f32 %v72_v37, %v54_v31 }
  0x46   :  { %v83_v40 = vadd.f32 %v81_v38, %v55_v34 }
  0x48   :  { %v84_v41 = vadd.f32 %v83_v40, %v82_v39 }
  0x4a   :  { %85 = vadd.xlane.f32.xlu0 %v84_v41 }
  0xd3   :  { %v86_v42 = vpop.xlane.xlu0 %85 }
  0xd4   :  { %v87_v43 = vrot.slane %v86_v42, 4 }
  0xd6   :  { %v88_v44 = vadd.f32 %v87_v43, %v86_v42 }
  0xd8   :  { %v89_v45 = vrot.slane %v88_v44, 2 }
  0xda   :  { %v90_v46 = vadd.f32 %v89_v45, %v88_v44 }
  0xdc   :  { %v91_v47 = vrot.slane %v90_v46, 1 }
  0xde   :  { %v92_v48 = vadd.f32 %v91_v47, %v90_v46 }
  0xe0   :  { %117 = vpush %v92_v48 }
 0x111   :  { %s118_s23 = spop %117 }
 0x112   :  { %v94_v49 = vstv %s118_s23 }
 0x113   :  { %96 = vst.msk [vmem:[#allocation7] sm:$0x1] %vm95_vm2, %v94_v49 }
 0x114   :  { %185 = shalt.err (!%p182_p0)
}
 0x115   :  { %106 = dma.vmem_to_hbm [thread:$0]  %s104_s1, 16, %s233_s2, [#allocation4]  }
 0x116   :  { %198 = dma.done.wait [#allocation4], 16  }
 0x117   :  { %199 = vsyncadd [#allocation4], 4294967280 }
 0x118   :  { %110 = vsyncpa [#allocation3], 1 }
 0x119   :  { %111 = vsyncpa [#allocation6], 1 }
 0x11a   :  { %112 = vsyncpa [#allocation4], 1 }

</bundles_post_ra>
